<compile_context>
chip_gen: v5e
topology: v5e:2x2
jax: 0.10.0
libtpu: 0.0.40
codegen_flags: <defaults>
</compile_context>

<pallas_src>
import functools

import jax
import jax.numpy as jnp
from jax.experimental import pallas as pl
from jax.experimental.pallas import tpu as pltpu

# Finite "minus infinity" sentinel (plain Python float: must NOT be a jnp
# array, or the kernel would capture a constant and fail to trace).  Finite so
# fully-masked (padded) rows stay NaN-free through the online max/exp.
_NEG = -1e30


def _flatnce_kernel(sim_ref, out_ref, m_sc, l_sc, pos_sc, *, B, TM, TK):
    """One (row-tile, column-tile) step of the online FlatNCE log-partition.

    sim_ref: [TM, TK] similarity tile (input dtype; cast to f32 in-register)
    out_ref: [TM, 1]  clogits output tile (written on the last column tile)
    m_sc / l_sc / pos_sc: [TM, 1] f32 VMEM accumulators (max, sum-exp, diag).
    """
    i = pl.program_id(0)  # row-tile index    (parallel)
    j = pl.program_id(1)  # column-tile index (reduction axis, last)

    @pl.when(j == 0)
    def _init():
        m_sc[...] = jnp.full_like(m_sc, _NEG)
        l_sc[...] = jnp.zeros_like(l_sc)
        pos_sc[...] = jnp.zeros_like(pos_sc)

    def _online_update(s):
        # Flash-style online logsumexp update over this column tile.
        m_old = m_sc[...]
        m_new = jnp.maximum(m_old, jnp.max(s, axis=1, keepdims=True))
        l_sc[...] = l_sc[...] * jnp.exp(m_old - m_new) + jnp.sum(
            jnp.exp(s - m_new), axis=1, keepdims=True
        )
        m_sc[...] = m_new

    # --- scalar-unit gating: does this tile need any mask work at all? ------
    row_start = i * TM
    col_start = j * TK
    # Tile touches the diagonal band iff [row_start, row_start+TM) overlaps
    # [col_start, col_start+TK).
    overlaps_diag = jnp.logical_and(
        row_start < col_start + TK, col_start < row_start + TM
    )
    has_ragged_cols = (B % TK) != 0  # static Python bool
    if has_ragged_cols:
        needs_mask = jnp.logical_or(overlaps_diag, j == pl.num_programs(1) - 1)
    else:
        needs_mask = overlaps_diag

    @pl.when(needs_mask)
    def _masked_tile():
        # Slow path: only the O(B/TK + B/TM) tiles on the diagonal band plus
        # the single ragged last column tile ever run this.
        sim = sim_ref[...].astype(jnp.float32)
        row_g = row_start + jax.lax.broadcasted_iota(jnp.int32, (TM, TK), 0)
        col_g = col_start + jax.lax.broadcasted_iota(jnp.int32, (TM, TK), 1)
        diag = row_g == col_g

        # Positive (diagonal) similarity: at most one entry per row lands in
        # any given column tile, so accumulation across tiles is exact.
        pos_sc[...] += jnp.sum(
            jnp.where(diag, sim, 0.0), axis=1, keepdims=True
        )

        mask = diag
        if has_ragged_cols:
            mask = jnp.logical_or(mask, col_g >= B)  # padded columns
        _online_update(jnp.where(mask, _NEG, sim))

    @pl.when(jnp.logical_not(needs_mask))
    def _fast_tile():
        # Fast path (vast majority of tiles for large B): cast + online
        # max/exp/sum only -> HBM-bound.
        _online_update(sim_ref[...].astype(jnp.float32))

    @pl.when(j == pl.num_programs(1) - 1)
    def _finalize():
        # logsumexp_{j!=i}(sim[i,j] - sim[i,i])
        #   = logsumexp_{j!=i}(sim[i,j]) - sim[i,i]
        out_ref[...] = (m_sc[...] + jnp.log(l_sc[...])) - pos_sc[...]


def _round_up(x, m):
    return ((x + m - 1) // m) * m


def flatnce_clogits(similarity, *, tm=512, tk=4096):
    """Per-row FlatNCE log-partition [B, 1] via a row/column-tiled Pallas kernel.

    tm: row-tile cap (multiple of the dtype's sublane packing when B > tm).
    tk: column-tile cap (multiple of 128 when B > tk).  512 x 4096 keeps the
        double-buffered input plus f32 intermediates under ~48 MiB, which fits
        v7x's 64 MiB VMEM as well as v5e/v6e's 128 MiB.
    """
    B = similarity.shape[0]
    assert similarity.ndim == 2 and similarity.shape == (B, B), (
        "similarity must be square [B, B]"
    )

    itemsize = jnp.dtype(similarity.dtype).itemsize
    # Native sublane packing: 8 rows (32-bit), 16 (16-bit), 32 (8-bit).
    sublane = max(8, 32 // max(itemsize, 1))

    # Column (reduction) tile: whole row when it fits -> single reduction step.
    if B <= tk:
        TK = B
    else:
        assert tk % 128 == 0, "tk must be a multiple of 128 when tiling columns"
        TK = tk

    # Row (parallel) tile: prefer >= 2 row tiles so v7x megacore shards the
    # parallel axis even for small/medium B (no cost on single-TC v5e/v6e).
    if B > tm:
        assert tm % sublane == 0, (
            f"tm must be a multiple of {sublane} for dtype {similarity.dtype}"
        )
        TM = tm
    elif B > sublane:
        half = _round_up(pl.cdiv(B, 2), sublane)
        TM = half if half < B else B
    else:
        TM = B

    grid = (pl.cdiv(B, TM), pl.cdiv(B, TK))

    # VMEM budget: 2x double-buffered input tile + headroom for the in-kernel
    # f32 cast / elementwise intermediates + scratch.  Capped at 48 MiB so the
    # same configuration compiles on v7x (64 MiB physical VMEM); v5e/v6e have
    # 128 MiB and could go higher if tiles are enlarged further.
    tile_bytes = TM * TK * itemsize
    vmem_limit = 2 * tile_bytes + 2 * TM * TK * 4 + (4 << 20)
    vmem_limit = int(max(32 << 20, min(vmem_limit, 48 << 20)))

    kernel = functools.partial(_flatnce_kernel, B=B, TM=TM, TK=TK)

    return pl.pallas_call(
        kernel,
        out_shape=jax.ShapeDtypeStruct((B, 1), jnp.float32),
        grid_spec=pltpu.PrefetchScalarGridSpec(
            num_scalar_prefetch=0,
            grid=grid,
            in_specs=[pl.BlockSpec((TM, TK), lambda i, j: (i, j))],
            # Same output block across the column (reduction) axis -> resident.
            out_specs=pl.BlockSpec((TM, 1), lambda i, j: (i, 0)),
            scratch_shapes=[
                pltpu.VMEM((TM, 1), jnp.float32),  # running max m
                pltpu.VMEM((TM, 1), jnp.float32),  # running sum-exp l
                pltpu.VMEM((TM, 1), jnp.float32),  # diagonal (positive) sim
            ],
        ),
        compiler_params=pltpu.CompilerParams(
            dimension_semantics=("parallel", "arbitrary"),
            vmem_limit_bytes=vmem_limit,
        ),
        # NOTE: no dtype cast at the call site — the HBM-resident matrix keeps
        # its dtype (e.g. bf16), halving DMA bytes for this memory-bound kernel.
    )(similarity)


def flatnce_loss(similarity):
    """Full FlatNCE forward: exp(clogits - detach(clogits)).mean()."""
    clogits = flatnce_clogits(similarity)
    return jnp.mean(jnp.exp(clogits - jax.lax.stop_gradient(clogits)))


if __name__ == "__main__":
    key = jax.random.PRNGKey(0)

    def make_similarity(B, H, dtype=jnp.float32):
        # Build similarity the way a contrastive pipeline would:
        # normalized features -> cosine similarity / temperature.
        feats = jax.random.normal(key, (B, H), dtype=jnp.float32)
        feats = feats / jnp.linalg.norm(feats, axis=-1, keepdims=True)
        return ((feats @ feats.T) / jnp.float32(0.1)).astype(dtype)

    def reference_clogits(similarity):
        sim = similarity.astype(jnp.float32)
        B = sim.shape[0]
        mask = jnp.eye(B, dtype=bool)
        pos = jnp.sum(jnp.where(mask, sim, 0.0), axis=1, keepdims=True)
        logits = jnp.where(mask, -jnp.inf, sim - pos)
        return jax.scipy.special.logsumexp(logits, axis=1, keepdims=True)

    # 1) small case (single tile), matching the module's toy scale
    sim_small = make_similarity(8, 32)
    clogits_small = flatnce_clogits(sim_small)
    loss_small = flatnce_loss(sim_small)
    jax.block_until_ready((clogits_small, loss_small))
    assert jnp.allclose(clogits_small, reference_clogits(sim_small), atol=1e-4, rtol=1e-4)
    assert jnp.allclose(loss_small, 1.0, atol=1e-6)

    # 2) default tiling: B=200 splits the row axis into 2 tiles (megacore path)
    #    with a partial last row tile; single column tile.
    sim_mid = make_similarity(200, 32)
    clogits_mid = flatnce_clogits(sim_mid)
    jax.block_until_ready(clogits_mid)
    assert jnp.allclose(clogits_mid, reference_clogits(sim_mid), atol=1e-4, rtol=1e-4)

    # 3) forced small tiles: exercises the fast (no-mask) path on off-diagonal
    #    tiles, the diagonal-band slow path, the ragged last column tile and
    #    the online-logsumexp reduction across column tiles.
    clogits_tiled = flatnce_clogits(sim_mid, tm=128, tk=128)
    jax.block_until_ready(clogits_tiled)
    assert jnp.allclose(clogits_tiled, reference_clogits(sim_mid), atol=1e-4, rtol=1e-4)

    # 4) bf16 input stays bf16 in HBM (half the DMA traffic); f32 cast in-kernel
    sim_bf16 = make_similarity(200, 32, dtype=jnp.bfloat16)
    clogits_bf16 = flatnce_clogits(sim_bf16, tm=128, tk=128)
    jax.block_until_ready(clogits_bf16)
    assert jnp.allclose(clogits_bf16, reference_clogits(sim_bf16), atol=1e-3, rtol=1e-3)

    print("KERNEL_OK")
</pallas_src>

<mosaic_0001>
module attributes {stable_mosaic.version = 11 : i64} {
  func.func @_flatnce_kernel(%arg0: i32, %arg1: i32, %arg2: memref<8x8xf32, #tpu.memory_space<vmem>>, %arg3: memref<8x1xf32, #tpu.memory_space<vmem>>, %arg4: memref<8x1xf32, #tpu.memory_space<vmem>>, %arg5: memref<8x1xf32, #tpu.memory_space<vmem>>, %arg6: memref<8x1xf32, #tpu.memory_space<vmem>>) attributes {dimension_semantics = [#tpu.dimension_semantics<parallel>, #tpu.dimension_semantics<arbitrary>], iteration_bounds = array<i64: 1, 1>, scalar_prefetch = 0 : i64, scratch_operands = 3 : i64, tpu.core_type = #tpu.core_type<tc>, window_params = [{transform_indices = @transform_0, window_bounds = array<i64: 8, 8>}, {transform_indices = @transform_1, window_bounds = array<i64: 8, 1>}]} {
    %c0_i32 = arith.constant 0 : i32
    %0 = arith.cmpi eq, %arg1, %c0_i32 : i32
    %1 = arith.extui %0 : i1 to i32
    %c0_i32_0 = arith.constant 0 : i32
    %2 = arith.cmpi ne, %1, %c0_i32_0 : i32
    scf.if %2 {
      %cst = arith.constant -1.000000e+30 : f32
      %18 = vector.broadcast %cst : f32 to vector<8x1xf32>
      %c0 = arith.constant 0 : index
      %c0_8 = arith.constant 0 : index
      %19 = vector.load %arg4[%c0, %c0_8] : memref<8x1xf32, #tpu.memory_space<vmem>>, vector<8x1xf32>
      tpu.vector_store %arg4[%c0, %c0_8], %18 {strides = array<i32>} : memref<8x1xf32, #tpu.memory_space<vmem>>, vector<8x1xf32>,
      %cst_9 = arith.constant 0.000000e+00 : f32
      %20 = vector.broadcast %cst_9 : f32 to vector<8x1xf32>
      %c0_10 = arith.constant 0 : index
      %c0_11 = arith.constant 0 : index
      %21 = vector.load %arg5[%c0_10, %c0_11] : memref<8x1xf32, #tpu.memory_space<vmem>>, vector<8x1xf32>
      tpu.vector_store %arg5[%c0_10, %c0_11], %20 {strides = array<i32>} : memref<8x1xf32, #tpu.memory_space<vmem>>, vector<8x1xf32>,
      %cst_12 = arith.constant 0.000000e+00 : f32
      %22 = vector.broadcast %cst_12 : f32 to vector<8x1xf32>
      %c0_13 = arith.constant 0 : index
      %c0_14 = arith.constant 0 : index
      %23 = vector.load %arg6[%c0_13, %c0_14] : memref<8x1xf32, #tpu.memory_space<vmem>>, vector<8x1xf32>
      tpu.vector_store %arg6[%c0_13, %c0_14], %22 {strides = array<i32>} : memref<8x1xf32, #tpu.memory_space<vmem>>, vector<8x1xf32>,
    } else {
    }
    %c8_i32 = arith.constant 8 : i32
    %3 = arith.muli %arg0, %c8_i32 : i32
    %c8_i32_1 = arith.constant 8 : i32
    %4 = arith.muli %arg1, %c8_i32_1 : i32
    %c8_i32_2 = arith.constant 8 : i32
    %5 = arith.addi %4, %c8_i32_2 : i32
    %6 = arith.cmpi slt, %3, %5 : i32
    %c8_i32_3 = arith.constant 8 : i32
    %7 = arith.addi %3, %c8_i32_3 : i32
    %8 = arith.cmpi slt, %4, %7 : i32
    %9 = arith.andi %6, %8 : i1
    %10 = arith.extui %9 : i1 to i32
    %c0_i32_4 = arith.constant 0 : i32
    %11 = arith.cmpi ne, %10, %c0_i32_4 : i32
    scf.if %11 {
      %c0 = arith.constant 0 : index
      %c0_8 = arith.constant 0 : index
      %18 = vector.load %arg2[%c0, %c0_8] : memref<8x8xf32, #tpu.memory_space<vmem>>, vector<8x8xf32>
      %19 = tpu.iota {dimensions = array<i32: 0>} : vector<8x8xi32>
      %20 = vector.broadcast %3 : i32 to vector<8x8xi32>
      %21 = arith.addi %20, %19 : vector<8x8xi32>
      %22 = tpu.iota {dimensions = array<i32: 1>} : vector<8x8xi32>
      %23 = vector.broadcast %4 : i32 to vector<8x8xi32>
      %24 = arith.addi %23, %22 : vector<8x8xi32>
      %25 = arith.cmpi eq, %21, %24 : vector<8x8xi32>
      %c0_9 = arith.constant 0 : index
      %c0_10 = arith.constant 0 : index
      %26 = vector.load %arg6[%c0_9, %c0_10] : memref<8x1xf32, #tpu.memory_space<vmem>>, vector<8x1xf32>
      %cst = arith.constant 0.000000e+00 : f32
      %27 = vector.broadcast %cst : f32 to vector<8x8xf32>
      %28 = arith.select %25, %18, %27 : vector<8x8xi1>, vector<8x8xf32>
      %cst_11 = arith.constant dense<0.000000e+00> : vector<8xf32>
      %29 = vector.multi_reduction <add>, %28, %cst_11 [1] : vector<8x8xf32> to vector<8xf32>
      %30 = vector.shape_cast %29 : vector<8xf32> to vector<8x1xf32>
      %31 = arith.addf %26, %30 : vector<8x1xf32>
      %c0_12 = arith.constant 0 : index
      %c0_13 = arith.constant 0 : index
      %32 = vector.load %arg6[%c0_12, %c0_13] : memref<8x1xf32, #tpu.memory_space<vmem>>, vector<8x1xf32>
      tpu.vector_store %arg6[%c0_12, %c0_13], %31 {strides = array<i32>} : memref<8x1xf32, #tpu.memory_space<vmem>>, vector<8x1xf32>,
      %cst_14 = arith.constant -1.000000e+30 : f32
      %33 = vector.broadcast %cst_14 : f32 to vector<8x8xf32>
      %34 = arith.select %25, %33, %18 : vector<8x8xi1>, vector<8x8xf32>
      %c0_15 = arith.constant 0 : index
      %c0_16 = arith.constant 0 : index
      %35 = vector.load %arg4[%c0_15, %c0_16] : memref<8x1xf32, #tpu.memory_space<vmem>>, vector<8x1xf32>
      %cst_17 = arith.constant dense<0xFF800000> : vector<8xf32>
      %36 = vector.multi_reduction <maximumf>, %34, %cst_17 [1] : vector<8x8xf32> to vector<8xf32>
      %37 = vector.shape_cast %36 : vector<8xf32> to vector<8x1xf32>
      %38 = arith.maximumf %35, %37 : vector<8x1xf32>
      %c0_18 = arith.constant 0 : index
      %c0_19 = arith.constant 0 : index
      %39 = vector.load %arg5[%c0_18, %c0_19] : memref<8x1xf32, #tpu.memory_space<vmem>>, vector<8x1xf32>
      %40 = arith.subf %35, %38 : vector<8x1xf32>
      %41 = math.exp %40 : vector<8x1xf32>
      %42 = arith.mulf %39, %41 : vector<8x1xf32>
      %43 = vector.broadcast %38 : vector<8x1xf32> to vector<8x8xf32>
      %44 = arith.subf %34, %43 : vector<8x8xf32>
      %45 = math.exp %44 : vector<8x8xf32>
      %cst_20 = arith.constant dense<0.000000e+00> : vector<8xf32>
      %46 = vector.multi_reduction <add>, %45, %cst_20 [1] : vector<8x8xf32> to vector<8xf32>
      %47 = vector.shape_cast %46 : vector<8xf32> to vector<8x1xf32>
      %48 = arith.addf %42, %47 : vector<8x1xf32>
      %c0_21 = arith.constant 0 : index
      %c0_22 = arith.constant 0 : index
      %49 = vector.load %arg5[%c0_21, %c0_22] : memref<8x1xf32, #tpu.memory_space<vmem>>, vector<8x1xf32>
      tpu.vector_store %arg5[%c0_21, %c0_22], %48 {strides = array<i32>} : memref<8x1xf32, #tpu.memory_space<vmem>>, vector<8x1xf32>,
      %c0_23 = arith.constant 0 : index
      %c0_24 = arith.constant 0 : index
      %50 = vector.load %arg4[%c0_23, %c0_24] : memref<8x1xf32, #tpu.memory_space<vmem>>, vector<8x1xf32>
      tpu.vector_store %arg4[%c0_23, %c0_24], %38 {strides = array<i32>} : memref<8x1xf32, #tpu.memory_space<vmem>>, vector<8x1xf32>,
    } else {
    }
    %true = arith.constant true
    %12 = arith.xori %9, %true : i1
    %13 = arith.extui %12 : i1 to i32
    %c0_i32_5 = arith.constant 0 : i32
    %14 = arith.cmpi ne, %13, %c0_i32_5 : i32
    scf.if %14 {
      %c0 = arith.constant 0 : index
      %c0_8 = arith.constant 0 : index
      %18 = vector.load %arg2[%c0, %c0_8] : memref<8x8xf32, #tpu.memory_space<vmem>>, vector<8x8xf32>
      %c0_9 = arith.constant 0 : index
      %c0_10 = arith.constant 0 : index
      %19 = vector.load %arg4[%c0_9, %c0_10] : memref<8x1xf32, #tpu.memory_space<vmem>>, vector<8x1xf32>
      %cst = arith.constant dense<0xFF800000> : vector<8xf32>
      %20 = vector.multi_reduction <maximumf>, %18, %cst [1] : vector<8x8xf32> to vector<8xf32>
      %21 = vector.shape_cast %20 : vector<8xf32> to vector<8x1xf32>
      %22 = arith.maximumf %19, %21 : vector<8x1xf32>
      %c0_11 = arith.constant 0 : index
      %c0_12 = arith.constant 0 : index
      %23 = vector.load %arg5[%c0_11, %c0_12] : memref<8x1xf32, #tpu.memory_space<vmem>>, vector<8x1xf32>
      %24 = arith.subf %19, %22 : vector<8x1xf32>
      %25 = math.exp %24 : vector<8x1xf32>
      %26 = arith.mulf %23, %25 : vector<8x1xf32>
      %27 = vector.broadcast %22 : vector<8x1xf32> to vector<8x8xf32>
      %28 = arith.subf %18, %27 : vector<8x8xf32>
      %29 = math.exp %28 : vector<8x8xf32>
      %cst_13 = arith.constant dense<0.000000e+00> : vector<8xf32>
      %30 = vector.multi_reduction <add>, %29, %cst_13 [1] : vector<8x8xf32> to vector<8xf32>
      %31 = vector.shape_cast %30 : vector<8xf32> to vector<8x1xf32>
      %32 = arith.addf %26, %31 : vector<8x1xf32>
      %c0_14 = arith.constant 0 : index
      %c0_15 = arith.constant 0 : index
      %33 = vector.load %arg5[%c0_14, %c0_15] : memref<8x1xf32, #tpu.memory_space<vmem>>, vector<8x1xf32>
      tpu.vector_store %arg5[%c0_14, %c0_15], %32 {strides = array<i32>} : memref<8x1xf32, #tpu.memory_space<vmem>>, vector<8x1xf32>,
      %c0_16 = arith.constant 0 : index
      %c0_17 = arith.constant 0 : index
      %34 = vector.load %arg4[%c0_16, %c0_17] : memref<8x1xf32, #tpu.memory_space<vmem>>, vector<8x1xf32>
      tpu.vector_store %arg4[%c0_16, %c0_17], %22 {strides = array<i32>} : memref<8x1xf32, #tpu.memory_space<vmem>>, vector<8x1xf32>,
    } else {
    }
    %c0_i32_6 = arith.constant 0 : i32
    %15 = arith.cmpi eq, %arg1, %c0_i32_6 : i32
    %16 = arith.extui %15 : i1 to i32
    %c0_i32_7 = arith.constant 0 : i32
    %17 = arith.cmpi ne, %16, %c0_i32_7 : i32
    scf.if %17 {
      %c0 = arith.constant 0 : index
      %c0_8 = arith.constant 0 : index
      %18 = vector.load %arg4[%c0, %c0_8] : memref<8x1xf32, #tpu.memory_space<vmem>>, vector<8x1xf32>
      %c0_9 = arith.constant 0 : index
      %c0_10 = arith.constant 0 : index
      %19 = vector.load %arg5[%c0_9, %c0_10] : memref<8x1xf32, #tpu.memory_space<vmem>>, vector<8x1xf32>
      %20 = math.log %19 : vector<8x1xf32>
      %21 = arith.addf %18, %20 : vector<8x1xf32>
      %c0_11 = arith.constant 0 : index
      %c0_12 = arith.constant 0 : index
      %22 = vector.load %arg6[%c0_11, %c0_12] : memref<8x1xf32, #tpu.memory_space<vmem>>, vector<8x1xf32>
      %23 = arith.subf %21, %22 : vector<8x1xf32>
      %c0_13 = arith.constant 0 : index
      %c0_14 = arith.constant 0 : index
      %24 = vector.load %arg3[%c0_13, %c0_14] : memref<8x1xf32, #tpu.memory_space<vmem>>, vector<8x1xf32>
      tpu.vector_store %arg3[%c0_13, %c0_14], %23 {strides = array<i32>} : memref<8x1xf32, #tpu.memory_space<vmem>>, vector<8x1xf32>,
    } else {
    }
    return
  }
  func.func @transform_0(%arg0: i32, %arg1: i32) -> (i32, i32) {
    %c0_i32 = arith.constant 0 : i32
    return %arg0, %arg1 : i32, i32
  }
  func.func @transform_1(%arg0: i32, %arg1: i32) -> (i32, i32) {
    %c0_i32 = arith.constant 0 : i32
    %c0_i32_0 = arith.constant 0 : i32
    return %arg0, %c0_i32 : i32, i32
  }
}

</mosaic_0001>

<bundles_post_ra>
// kernel: tpu_custom_call.1
= control target key start
LH: loop header
LB: loop body
LE: loop exit
PB: predicated region body
PF: predicated region fallthrough
CT: control target
= control target key end

     0   :  { %6 = vsyncpa [#allocation6], 0  ;;  %s168_s9 = smov [#allocation5]   ;;  %s200_s0 = inlined_call_operand.hbm [shape: f32[8,8], index: 0, kind: input, shape index: {}]   ;;  %s201_s1 = inlined_call_operand.vmem [shape: f32[8,1], index: 1, kind: output, shape index: {}]  }
   0x1   :  { %s12_s8 = sshll.u32 %s200_s0, 4  ;;  %s14_s10 = sshll.u32 %s168_s9, 4  ;;  %s13_s8 = int_to_ptr.hbm [resolvable:$true] %s12_s8  ;;  %s15_s10 = int_to_ptr.vmem [resolvable:$true] %s14_s10 }
   0x2   :  { %17 = dma.hbm_to_vmem [thread:$0]  %s13_s8, 128, %s15_s10, [#allocation6]  }
   0x3   :  { %166 = dma.done.wait [#allocation6], 128  }
   0x4   :  { %167 = vsyncadd [#allocation6], 4294967168  ;;  %v41_v0 = vlaneseq  ;;  %vm26_vm0 = vcmask 7168   ;;  %v169_v1 = vmov -1e+30   ;;  %vm52_vm2 = vcmask 64512  }
   0x5   :  { %27 = vst.msk [vmem:[#allocation2] sm:$0xff] %vm26_vm0, %v169_v1  ;;  %v40_v4 = vld [vmem:[#allocation5] sm:$0xff]  ;;  %v170_v7 = vmov 0   ;;  %v171_v8 = vmov 0.0  }
   0x6   :  { %v42_v2 = vshrl.u32 %v41_v0, 7  ;;  %v46_v3 = vand.u32 127, %v41_v0  ;;  %135 = vset.pattern.permute.xlu0 %v170_v7  ;;  %28 = vst.msk [vmem:[#allocation3] sm:$0xff] %vm26_vm0, %v171_v8 }
   0x7   :  { %29 = vst.msk [vmem:[#allocation4] sm:$0xff] %vm26_vm0, %v171_v8 }
   0x8   :  { %vm49_vm1 = vcmp.eq.s32.totalorder %v42_v2, %v46_v3 }
   0x9   :  { %v59_v5 = vsel %vm49_vm1, -1e+30, %v40_v4  ;;  %v51_v18 = vsel %vm49_vm1, %v40_v4, 0.0 }
   0xa   :  { %v61_v6 = vsel %vm52_vm2, %v59_v5, -inf  ;;  %v53_v19 = vsel %vm52_vm2, %v51_v18, 0.0 }
   0xb   :  { %62 = vmax.xlane.f32.xlu0 %v61_v6 }
   0xc   :  { %v60_v9 = vld [vmem:[#allocation2] sm:$0xff] }
   0xd   :  { %v65_v22 = vld [vmem:[#allocation3] sm:$0xff] }
   0xe   :  { %v50_v26 = vld [vmem:[#allocation4] sm:$0xff] }
  0x7e   :  { %v63_v10 = vpop.xlane.xlu0 %62 }
  0x7f   :  { %v64_v11 = vmax.f32 %v60_v9, %v63_v10 }
  0x81   :  { %v66_v12 = vsub.f32 %v60_v9, %v64_v11  ;;  %83 = vst.msk [vmem:[#allocation2] sm:$0xff] %vm26_vm0, %v64_v11  ;;  %72 = vperm.xlu0 %135, %v64_v11  }
  0x83   :  { %v67_v20 = vmul.f32 1.442695, %v66_v12 }
  0x88   :  { %v117_v32 = vld [vmem:[#allocation2] sm:$0xff] }
  0xf3   :  { %v73_v13 = vpop.permute.xlu0 %72 }
  0xf4   :  { %v75_v14 = vsub.f32 %v59_v5, %v73_v13 }
  0xf6   :  { %v76_v15 = vmul.f32 1.442695, %v75_v14 }
  0xf8   :  { %136 = vpow2.f32 %v76_v15 }
  0xf9   :  { %138 = vpow2.f32 %v67_v20 }
  0xfe   :  { %v137_v16 = vpop.eup %136 }
  0xff   :  { %v78_v17 = vsel %vm52_vm2, %v137_v16, 0.0  ;;  %v139_v21 = vpop.eup %138 }
 0x100   :  { %79 = vadd.xlane.f32.xlu1 %v78_v17  ;;  %v69_v23 = vmul.f32 %v139_v21, %v65_v22 }
 0x108   :  { %54 = vadd.xlane.f32.xlu1 %v53_v19 }
 0x173   :  { %v80_v24 = vpop.xlane.xlu1 %79 }
 0x174   :  { %v81_v25 = vadd.f32 %v80_v24, %v69_v23 }
 0x176   :  { %82 = vst.msk [vmem:[#allocation3] sm:$0xff] %vm26_vm0, %v81_v25 }
 0x17b   :  { %v55_v27 = vpop.xlane.xlu1 %54 }
 0x17c   :  { %v56_v28 = vadd.f32 %v55_v27, %v50_v26 }
 0x17d   :  { %v118_v29 = vld [vmem:[#allocation3] sm:$0xff] }
 0x17e   :  { %140 = vlog2.f32 %v118_v29  ;;  %58 = vst.msk [vmem:[#allocation4] sm:$0xff] %vm26_vm0, %v56_v28 }
 0x184   :  { %v141_v30 = vpop.eup %140 }
 0x185   :  { %v120_v31 = vmul.f32 0.6931472, %v141_v30  ;;  %v122_v33 = vld [vmem:[#allocation4] sm:$0xff] }
 0x187   :  { %v121_v34 = vadd.f32 %v120_v31, %v117_v32 }
 0x189   :  { %v123_v35 = vsub.f32 %v121_v34, %v122_v33 }
 0x18b   :  { %125 = vst.msk [vmem:[%s201_s1] sm:$0xff] %vm26_vm0, %v123_v35 }
 0x18c   :  { %130 = vsyncpa [#allocation6], 1 }

</bundles_post_ra>
